<compile_context>
chip_gen: v7x
topology: tpu7x:2x2x1
jax: 0.10.0
libtpu: 0.0.40
codegen_flags: <defaults>
</compile_context>

<pallas_src>
import math

import jax
import jax.numpy as jnp
from jax.experimental import pallas as pl
from jax.experimental.pallas import tpu as pltpu

EPS = 1e-5
_LANE = 128


# ------------------------------ small helpers ------------------------------

def _round_up(n, m):
    return ((n + m - 1) // m) * m


def _lane_tile(hwp, max_lanes=512):
    """Largest multiple of 128 that divides hwp and is <= max_lanes."""
    n = hwp // _LANE
    for d in range(min(n, max_lanes // _LANE), 0, -1):
        if n % d == 0:
            return _LANE * d
    return _LANE


def _pad_last(a, target):
    pad = target - a.shape[-1]
    if pad == 0:
        return a
    cfg = [(0, 0)] * (a.ndim - 1) + [(0, pad)]
    return jnp.pad(a, cfg)


def im2col_spatial(x, k):
    """x: [N,T,C,H,W] -> [N,T,k*k*C,H*W]; 'same' zero padding, stride 1."""
    N, T, C, H, W = x.shape
    p = k // 2
    xp = jnp.pad(x, ((0, 0), (0, 0), (0, 0), (p, p), (p, p)))
    taps = []
    for dy in range(k):
        for dx in range(k):
            taps.append(xp[:, :, :, dy:dy + H, dx:dx + W])
    xs = jnp.stack(taps, axis=2)                      # [N,T,k*k,C,H,W]
    return xs.reshape(N, T, k * k * C, H * W)


# ------------------------------ Pallas kernel ------------------------------

def _make_stconv_kernel(T, k, has_residual):
    """Fused: relu(out_bn(temporal(relu(sp_bn(spatial(x)))))[ + residual])."""
    pad = k // 2

    def kernel(*refs):
        if has_residual:
            (xsp_ref, wsp_ref, ssp_ref, tsp_ref,
             wt_ref, so_ref, to_ref, res_ref, o_ref, y_ref) = refs
        else:
            (xsp_ref, wsp_ref, ssp_ref, tsp_ref,
             wt_ref, so_ref, to_ref, o_ref, y_ref) = refs
            res_ref = None

        # zero the temporal halo frames of the VMEM-resident intermediate
        zero_frame = jnp.zeros(y_ref.shape[1:], y_ref.dtype)
        for i in range(pad):
            y_ref[i] = zero_frame
            y_ref[pad + T + i] = zero_frame

        w_sp = wsp_ref[...]
        sp_scale = ssp_ref[...]
        sp_shift = tsp_ref[...]
        # spatial (1,k,k) conv (pre-im2col'd, pixels on lanes) + folded BN/bias + ReLU
        for t in range(T):
            acc = jnp.dot(w_sp, xsp_ref[0, t],
                          preferred_element_type=jnp.float32)      # [intermed, Lt]
            y = jnp.maximum(acc * sp_scale + sp_shift, 0.0)
            y_ref[pad + t] = y.astype(y_ref.dtype)

        out_scale = so_ref[...]
        out_shift = to_ref[...]
        # temporal (k,1,1) conv + folded BN/bias (+ residual) + ReLU
        for t in range(T):
            acc = jnp.dot(wt_ref[0], y_ref[t],
                          preferred_element_type=jnp.float32)      # [Cout, Lt]
            for dt in range(1, k):
                acc = acc + jnp.dot(wt_ref[dt], y_ref[t + dt],
                                    preferred_element_type=jnp.float32)
            z = acc * out_scale + out_shift
            if has_residual:
                z = z + res_ref[0, t].astype(jnp.float32)
            o_ref[0, t] = jnp.maximum(z, 0.0).astype(o_ref.dtype)

    return kernel


def st_conv_pallas(x, cp, residual=None):
    """Fused SpatioTemporalConv + folded BNs + ReLU(s) (+ residual add).

    x: [N,T,Cin,H,W] bf16 -> [N,T,Cout,H,W] bf16.
    """
    N, T, Cin, H, W = x.shape
    k = cp['k']
    pad = k // 2
    intermed, Ksp = cp['w_sp'].shape
    Cout = cp['w_t'].shape[1]
    HW = H * W
    HWp = _round_up(HW, _LANE)                 # lane-dense pixel axis
    Lt = _lane_tile(HWp)

    xsp = _pad_last(im2col_spatial(x, k), HWp).astype(jnp.bfloat16)   # [N,T,Ksp,HWp]

    args = [xsp,
            cp['w_sp'],
            cp['sp_scale'].reshape(intermed, 1),
            cp['sp_shift'].reshape(intermed, 1),
            cp['w_t'],
            cp['out_scale'].reshape(Cout, 1),
            cp['out_shift'].reshape(Cout, 1)]
    in_specs = [
        pl.BlockSpec((1, T, Ksp, Lt), lambda n, j: (n, 0, 0, j)),
        pl.BlockSpec((intermed, Ksp), lambda n, j: (0, 0)),
        pl.BlockSpec((intermed, 1), lambda n, j: (0, 0)),
        pl.BlockSpec((intermed, 1), lambda n, j: (0, 0)),
        pl.BlockSpec((k, Cout, intermed), lambda n, j: (0, 0, 0)),
        pl.BlockSpec((Cout, 1), lambda n, j: (0, 0)),
        pl.BlockSpec((Cout, 1), lambda n, j: (0, 0)),
    ]
    has_res = residual is not None
    if has_res:
        res = _pad_last(residual.reshape(N, T, Cout, HW), HWp).astype(jnp.bfloat16)
        args.append(res)
        in_specs.append(pl.BlockSpec((1, T, Cout, Lt), lambda n, j: (n, 0, 0, j)))

    out = pl.pallas_call(
        _make_stconv_kernel(T, k, has_res),
        out_shape=jax.ShapeDtypeStruct((N, T, Cout, HWp), jnp.bfloat16),
        grid=(N, HWp // Lt),
        in_specs=in_specs,
        out_specs=pl.BlockSpec((1, T, Cout, Lt), lambda n, j: (n, 0, 0, j)),
        scratch_shapes=[pltpu.VMEM((T + 2 * pad, intermed, Lt), jnp.bfloat16)],
        compiler_params=pltpu.CompilerParams(
            dimension_semantics=("parallel", "parallel")),
    )(*args)

    return out[..., :HW].reshape(N, T, Cout, H, W)


# ------------------------ pure-JAX reference (same math) -------------------

def st_conv_ref(x, cp, residual=None):
    N, T, Cin, H, W = x.shape
    k = cp['k']
    pad = k // 2
    Cout = cp['w_t'].shape[1]
    xsp = im2col_spatial(x, k).astype(jnp.bfloat16)                 # [N,T,Ksp,HW]
    y = jnp.einsum('ck,ntkp->ntcp', cp['w_sp'], xsp,
                   preferred_element_type=jnp.float32)
    y = y * cp['sp_scale'][None, None, :, None] + cp['sp_shift'][None, None, :, None]
    y = jnp.maximum(y, 0.0).astype(jnp.bfloat16)                    # [N,T,intermed,HW]
    yp = jnp.pad(y, ((0, 0), (pad, pad), (0, 0), (0, 0)))
    z = jnp.zeros((N, T, Cout, H * W), jnp.float32)
    for dt in range(k):
        z = z + jnp.einsum('ci,ntip->ntcp', cp['w_t'][dt], yp[:, dt:dt + T],
                           preferred_element_type=jnp.float32)
    z = z * cp['out_scale'][None, None, :, None] + cp['out_shift'][None, None, :, None]
    if residual is not None:
        z = z + residual.reshape(N, T, Cout, H * W).astype(jnp.float32)
    return jnp.maximum(z, 0.0).astype(jnp.bfloat16).reshape(N, T, Cout, H, W)


# -------------------------- parameter construction -------------------------

def bn_params(key, c):
    kg, kb, km, kv = jax.random.split(key, 4)
    gamma = 1.0 + 0.1 * jax.random.normal(kg, (c,), jnp.float32)
    beta = 0.1 * jax.random.normal(kb, (c,), jnp.float32)
    mean = 0.1 * jax.random.normal(km, (c,), jnp.float32)
    var = 1.0 + 0.1 * jax.random.uniform(kv, (c,), jnp.float32)
    scale = gamma / jnp.sqrt(var + EPS)
    shift = beta - mean * scale
    return scale, shift


def st_conv_params(key, cin, cout, k):
    # intermediate channel count exactly as in SpatioTemporalConv.__init__
    intermed = int(math.floor(k * k * k * cin * cout / (k * k * cin + k * cout)))
    k1, k2, k3, k4, k5 = jax.random.split(key, 5)
    w_sp = jax.random.normal(k1, (intermed, k * k * cin), jnp.float32) / math.sqrt(k * k * cin)
    b_sp = 0.05 * jax.random.normal(k2, (intermed,), jnp.float32)
    w_t = jax.random.normal(k3, (k, cout, intermed), jnp.float32) / math.sqrt(k * intermed)
    b_t = 0.05 * jax.random.normal(k4, (cout,), jnp.float32)
    bn_sp_scale, bn_sp_shift = bn_params(k5, intermed)
    return dict(k=k, w_sp=w_sp, b_sp=b_sp, w_t=w_t, b_t=b_t,
                bn_sp_scale=bn_sp_scale, bn_sp_shift=bn_sp_shift)


def fold_st_conv(conv, out_bn):
    """Fold conv biases + eval-mode BatchNorms into per-channel scale/shift (exact)."""
    sp_scale = conv['bn_sp_scale']
    sp_shift = conv['bn_sp_shift'] + sp_scale * conv['b_sp']
    out_scale, out_shift = out_bn
    out_shift = out_shift + out_scale * conv['b_t']
    return dict(k=conv['k'],
                w_sp=conv['w_sp'].astype(jnp.bfloat16),
                w_t=conv['w_t'].astype(jnp.bfloat16),
                sp_scale=sp_scale, sp_shift=sp_shift,
                out_scale=out_scale, out_shift=out_shift)


def res_block_params(key, cin, cout, k):
    k1, k2, k3, k4 = jax.random.split(key, 4)
    conv1 = st_conv_params(k1, cin, cout, k)
    bn1 = bn_params(k2, cout)
    conv2 = st_conv_params(k3, cout, cout, k)
    bn2 = bn_params(k4, cout)
    return dict(conv1=fold_st_conv(conv1, bn1), conv2=fold_st_conv(conv2, bn2))


def res_layer_params(key, cin, cout, k, layer_size):
    keys = jax.random.split(key, layer_size)
    blocks = [res_block_params(keys[0], cin, cout, k)]
    for i in range(1, layer_size):
        blocks.append(res_block_params(keys[i], cout, cout, k))
    return blocks


# ------------------------------- forward pass ------------------------------

def res_block_forward(x, bp, use_pallas=True):
    f = st_conv_pallas if use_pallas else st_conv_ref
    r = f(x, bp['conv1'])                    # relu1(bn1(conv1(x)))
    return f(r, bp['conv2'], residual=x)     # relu(x + bn2(conv2(r)))


def res_layer_forward(x, blocks, use_pallas=True):
    for bp in blocks:
        x = res_block_forward(x, bp, use_pallas=use_pallas)
    return x


# ----------------------------------- main ----------------------------------

if __name__ == "__main__":
    key = jax.random.PRNGKey(0)
    kx, kp = jax.random.split(key)

    # SpatioTemporalResLayer(in_channels=4, out_channels=4, kernel_size=3,
    #                        layer_size=2, downsample=False)
    N, C, T, H, W = 2, 4, 4, 8, 8
    Cout, ksz, layer_size = 4, 3, 2

    x_ncthw = jax.random.normal(kx, (N, C, T, H, W), jnp.float32)     # PyTorch NCTHW
    x = jnp.transpose(x_ncthw, (0, 2, 1, 3, 4)).astype(jnp.bfloat16)  # -> [N,T,C,H,W]

    params = res_layer_params(kp, C, Cout, ksz, layer_size)

    out = jax.block_until_ready(res_layer_forward(x, params, use_pallas=True))
    assert out.shape == (N, T, Cout, H, W)

    # correctness check against a pure-JAX reference of the same (bf16/folded) math
    ref = jax.block_until_ready(res_layer_forward(x, params, use_pallas=False))
    out_f = out.astype(jnp.float32)
    ref_f = ref.astype(jnp.float32)
    max_err = float(jnp.max(jnp.abs(out_f - ref_f)))
    assert bool(jnp.allclose(out_f, ref_f, atol=1e-1, rtol=1e-1)), max_err

    out_ncthw = jnp.transpose(out, (0, 2, 1, 3, 4))   # back to PyTorch NCTHW layout
    assert out_ncthw.shape == (N, Cout, T, H, W)
    print("KERNEL_OK")
</pallas_src>

<mosaic_0001>
module attributes {stable_mosaic.version = 11 : i64} {
  func.func @kernel(%arg0: i32, %arg1: i32, %arg2: memref<1x4x36x128xbf16, #tpu.memory_space<vmem>>, %arg3: memref<9x36xbf16, #tpu.memory_space<vmem>>, %arg4: memref<9x1xf32, #tpu.memory_space<vmem>>, %arg5: memref<9x1xf32, #tpu.memory_space<vmem>>, %arg6: memref<3x4x9xbf16, #tpu.memory_space<vmem>>, %arg7: memref<4x1xf32, #tpu.memory_space<vmem>>, %arg8: memref<4x1xf32, #tpu.memory_space<vmem>>, %arg9: memref<1x4x4x128xbf16, #tpu.memory_space<vmem>>, %arg10: memref<6x9x128xbf16, #tpu.memory_space<vmem>>) attributes {dimension_semantics = [#tpu.dimension_semantics<parallel>, #tpu.dimension_semantics<parallel>], iteration_bounds = array<i64: 2, 1>, scalar_prefetch = 0 : i64, scratch_operands = 1 : i64, tpu.core_type = #tpu.core_type<tc>, window_params = [{transform_indices = @transform_0, window_bounds = array<i64: 1, 4, 36, 128>}, {pipeline_mode = #tpu.pipeline_mode<synchronous>, transform_indices = @transform_1, window_bounds = array<i64: 9, 36>}, {pipeline_mode = #tpu.pipeline_mode<synchronous>, transform_indices = @transform_2, window_bounds = array<i64: 9, 1>}, {pipeline_mode = #tpu.pipeline_mode<synchronous>, transform_indices = @transform_3, window_bounds = array<i64: 9, 1>}, {pipeline_mode = #tpu.pipeline_mode<synchronous>, transform_indices = @transform_4, window_bounds = array<i64: 3, 4, 9>}, {pipeline_mode = #tpu.pipeline_mode<synchronous>, transform_indices = @transform_5, window_bounds = array<i64: 4, 1>}, {pipeline_mode = #tpu.pipeline_mode<synchronous>, transform_indices = @transform_6, window_bounds = array<i64: 4, 1>}, {transform_indices = @transform_7, window_bounds = array<i64: 1, 4, 4, 128>}]} {
    %cst = arith.constant 0.000000e+00 : bf16
    %0 = vector.broadcast %cst : bf16 to vector<9x128xbf16>
    %c0 = arith.constant 0 : index
    %c0_0 = arith.constant 0 : index
    %c0_1 = arith.constant 0 : index
    %1 = vector.load %arg10[%c0, %c0_0, %c0_1] : memref<6x9x128xbf16, #tpu.memory_space<vmem>>, vector<1x9x128xbf16>
    %2 = vector.shape_cast %1 : vector<1x9x128xbf16> to vector<9x128xbf16>
    %3 = vector.shape_cast %0 : vector<9x128xbf16> to vector<1x9x128xbf16>
    tpu.vector_store %arg10[%c0, %c0_0, %c0_1], %3 {strides = array<i32>} : memref<6x9x128xbf16, #tpu.memory_space<vmem>>, vector<1x9x128xbf16>,
    %c5 = arith.constant 5 : index
    %c0_2 = arith.constant 0 : index
    %c0_3 = arith.constant 0 : index
    %4 = vector.load %arg10[%c5, %c0_2, %c0_3] : memref<6x9x128xbf16, #tpu.memory_space<vmem>>, vector<1x9x128xbf16>
    %5 = vector.shape_cast %4 : vector<1x9x128xbf16> to vector<9x128xbf16>
    %6 = vector.shape_cast %0 : vector<9x128xbf16> to vector<1x9x128xbf16>
    tpu.vector_store %arg10[%c5, %c0_2, %c0_3], %6 {strides = array<i32>} : memref<6x9x128xbf16, #tpu.memory_space<vmem>>, vector<1x9x128xbf16>,
    %c0_4 = arith.constant 0 : index
    %c0_5 = arith.constant 0 : index
    %7 = vector.load %arg3[%c0_4, %c0_5] : memref<9x36xbf16, #tpu.memory_space<vmem>>, vector<9x36xbf16>
    %c0_6 = arith.constant 0 : index
    %c0_7 = arith.constant 0 : index
    %8 = vector.load %arg4[%c0_6, %c0_7] : memref<9x1xf32, #tpu.memory_space<vmem>>, vector<9x1xf32>
    %c0_8 = arith.constant 0 : index
    %c0_9 = arith.constant 0 : index
    %9 = vector.load %arg5[%c0_8, %c0_9] : memref<9x1xf32, #tpu.memory_space<vmem>>, vector<9x1xf32>
    %c0_10 = arith.constant 0 : index
    %c0_11 = arith.constant 0 : index
    %c0_12 = arith.constant 0 : index
    %c0_13 = arith.constant 0 : index
    %10 = vector.load %arg2[%c0_10, %c0_11, %c0_12, %c0_13] : memref<1x4x36x128xbf16, #tpu.memory_space<vmem>>, vector<1x1x36x128xbf16>
    %11 = vector.shape_cast %10 : vector<1x1x36x128xbf16> to vector<36x128xbf16>
    %cst_14 = arith.constant dense<0.000000e+00> : vector<9x128xf32>
    %12 = tpu.matmul %7, %11, %cst_14 {dimension_numbers = #tpu.dot_dimension_numbers<[1], [0], [0], [1], [0, 0, 1, 1], [], []>} : vector<9x36xbf16>, vector<36x128xbf16>, vector<9x128xf32> -> vector<9x128xf32>
    %13 = vector.broadcast %8 : vector<9x1xf32> to vector<9x128xf32>
    %14 = arith.mulf %12, %13 : vector<9x128xf32>
    %15 = vector.broadcast %9 : vector<9x1xf32> to vector<9x128xf32>
    %16 = arith.addf %14, %15 : vector<9x128xf32>
    %cst_15 = arith.constant 0.000000e+00 : f32
    %17 = vector.broadcast %cst_15 : f32 to vector<9x128xf32>
    %18 = arith.maximumf %16, %17 : vector<9x128xf32>
    %19 = arith.truncf %18 : vector<9x128xf32> to vector<9x128xbf16>
    %c1 = arith.constant 1 : index
    %c0_16 = arith.constant 0 : index
    %c0_17 = arith.constant 0 : index
    %20 = vector.load %arg10[%c1, %c0_16, %c0_17] : memref<6x9x128xbf16, #tpu.memory_space<vmem>>, vector<1x9x128xbf16>
    %21 = vector.shape_cast %20 : vector<1x9x128xbf16> to vector<9x128xbf16>
    %22 = vector.shape_cast %19 : vector<9x128xbf16> to vector<1x9x128xbf16>
    tpu.vector_store %arg10[%c1, %c0_16, %c0_17], %22 {strides = array<i32>} : memref<6x9x128xbf16, #tpu.memory_space<vmem>>, vector<1x9x128xbf16>,
    %c0_18 = arith.constant 0 : index
    %c1_19 = arith.constant 1 : index
    %c0_20 = arith.constant 0 : index
    %c0_21 = arith.constant 0 : index
    %23 = vector.load %arg2[%c0_18, %c1_19, %c0_20, %c0_21] : memref<1x4x36x128xbf16, #tpu.memory_space<vmem>>, vector<1x1x36x128xbf16>
    %24 = vector.shape_cast %23 : vector<1x1x36x128xbf16> to vector<36x128xbf16>
    %cst_22 = arith.constant dense<0.000000e+00> : vector<9x128xf32>
    %25 = tpu.matmul %7, %24, %cst_22 {dimension_numbers = #tpu.dot_dimension_numbers<[1], [0], [0], [1], [0, 0, 1, 1], [], []>} : vector<9x36xbf16>, vector<36x128xbf16>, vector<9x128xf32> -> vector<9x128xf32>
    %26 = vector.broadcast %8 : vector<9x1xf32> to vector<9x128xf32>
    %27 = arith.mulf %25, %26 : vector<9x128xf32>
    %28 = vector.broadcast %9 : vector<9x1xf32> to vector<9x128xf32>
    %29 = arith.addf %27, %28 : vector<9x128xf32>
    %cst_23 = arith.constant 0.000000e+00 : f32
    %30 = vector.broadcast %cst_23 : f32 to vector<9x128xf32>
    %31 = arith.maximumf %29, %30 : vector<9x128xf32>
    %32 = arith.truncf %31 : vector<9x128xf32> to vector<9x128xbf16>
    %c2 = arith.constant 2 : index
    %c0_24 = arith.constant 0 : index
    %c0_25 = arith.constant 0 : index
    %33 = vector.load %arg10[%c2, %c0_24, %c0_25] : memref<6x9x128xbf16, #tpu.memory_space<vmem>>, vector<1x9x128xbf16>
    %34 = vector.shape_cast %33 : vector<1x9x128xbf16> to vector<9x128xbf16>
    %35 = vector.shape_cast %32 : vector<9x128xbf16> to vector<1x9x128xbf16>
    tpu.vector_store %arg10[%c2, %c0_24, %c0_25], %35 {strides = array<i32>} : memref<6x9x128xbf16, #tpu.memory_space<vmem>>, vector<1x9x128xbf16>,
    %c0_26 = arith.constant 0 : index
    %c2_27 = arith.constant 2 : index
    %c0_28 = arith.constant 0 : index
    %c0_29 = arith.constant 0 : index
    %36 = vector.load %arg2[%c0_26, %c2_27, %c0_28, %c0_29] : memref<1x4x36x128xbf16, #tpu.memory_space<vmem>>, vector<1x1x36x128xbf16>
    %37 = vector.shape_cast %36 : vector<1x1x36x128xbf16> to vector<36x128xbf16>
    %cst_30 = arith.constant dense<0.000000e+00> : vector<9x128xf32>
    %38 = tpu.matmul %7, %37, %cst_30 {dimension_numbers = #tpu.dot_dimension_numbers<[1], [0], [0], [1], [0, 0, 1, 1], [], []>} : vector<9x36xbf16>, vector<36x128xbf16>, vector<9x128xf32> -> vector<9x128xf32>
    %39 = vector.broadcast %8 : vector<9x1xf32> to vector<9x128xf32>
    %40 = arith.mulf %38, %39 : vector<9x128xf32>
    %41 = vector.broadcast %9 : vector<9x1xf32> to vector<9x128xf32>
    %42 = arith.addf %40, %41 : vector<9x128xf32>
    %cst_31 = arith.constant 0.000000e+00 : f32
    %43 = vector.broadcast %cst_31 : f32 to vector<9x128xf32>
    %44 = arith.maximumf %42, %43 : vector<9x128xf32>
    %45 = arith.truncf %44 : vector<9x128xf32> to vector<9x128xbf16>
    %c3 = arith.constant 3 : index
    %c0_32 = arith.constant 0 : index
    %c0_33 = arith.constant 0 : index
    %46 = vector.load %arg10[%c3, %c0_32, %c0_33] : memref<6x9x128xbf16, #tpu.memory_space<vmem>>, vector<1x9x128xbf16>
    %47 = vector.shape_cast %46 : vector<1x9x128xbf16> to vector<9x128xbf16>
    %48 = vector.shape_cast %45 : vector<9x128xbf16> to vector<1x9x128xbf16>
    tpu.vector_store %arg10[%c3, %c0_32, %c0_33], %48 {strides = array<i32>} : memref<6x9x128xbf16, #tpu.memory_space<vmem>>, vector<1x9x128xbf16>,
    %c0_34 = arith.constant 0 : index
    %c3_35 = arith.constant 3 : index
    %c0_36 = arith.constant 0 : index
    %c0_37 = arith.constant 0 : index
    %49 = vector.load %arg2[%c0_34, %c3_35, %c0_36, %c0_37] : memref<1x4x36x128xbf16, #tpu.memory_space<vmem>>, vector<1x1x36x128xbf16>
    %50 = vector.shape_cast %49 : vector<1x1x36x128xbf16> to vector<36x128xbf16>
    %cst_38 = arith.constant dense<0.000000e+00> : vector<9x128xf32>
    %51 = tpu.matmul %7, %50, %cst_38 {dimension_numbers = #tpu.dot_dimension_numbers<[1], [0], [0], [1], [0, 0, 1, 1], [], []>} : vector<9x36xbf16>, vector<36x128xbf16>, vector<9x128xf32> -> vector<9x128xf32>
    %52 = vector.broadcast %8 : vector<9x1xf32> to vector<9x128xf32>
    %53 = arith.mulf %51, %52 : vector<9x128xf32>
    %54 = vector.broadcast %9 : vector<9x1xf32> to vector<9x128xf32>
    %55 = arith.addf %53, %54 : vector<9x128xf32>
    %cst_39 = arith.constant 0.000000e+00 : f32
    %56 = vector.broadcast %cst_39 : f32 to vector<9x128xf32>
    %57 = arith.maximumf %55, %56 : vector<9x128xf32>
    %58 = arith.truncf %57 : vector<9x128xf32> to vector<9x128xbf16>
    %c4 = arith.constant 4 : index
    %c0_40 = arith.constant 0 : index
    %c0_41 = arith.constant 0 : index
    %59 = vector.load %arg10[%c4, %c0_40, %c0_41] : memref<6x9x128xbf16, #tpu.memory_space<vmem>>, vector<1x9x128xbf16>
    %60 = vector.shape_cast %59 : vector<1x9x128xbf16> to vector<9x128xbf16>
    %61 = vector.shape_cast %58 : vector<9x128xbf16> to vector<1x9x128xbf16>
    tpu.vector_store %arg10[%c4, %c0_40, %c0_41], %61 {strides = array<i32>} : memref<6x9x128xbf16, #tpu.memory_space<vmem>>, vector<1x9x128xbf16>,
    %c0_42 = arith.constant 0 : index
    %c0_43 = arith.constant 0 : index
    %62 = vector.load %arg7[%c0_42, %c0_43] : memref<4x1xf32, #tpu.memory_space<vmem>>, vector<4x1xf32>
    %c0_44 = arith.constant 0 : index
    %c0_45 = arith.constant 0 : index
    %63 = vector.load %arg8[%c0_44, %c0_45] : memref<4x1xf32, #tpu.memory_space<vmem>>, vector<4x1xf32>
    %c0_46 = arith.constant 0 : index
    %c0_47 = arith.constant 0 : index
    %c0_48 = arith.constant 0 : index
    %64 = vector.load %arg6[%c0_46, %c0_47, %c0_48] : memref<3x4x9xbf16, #tpu.memory_space<vmem>>, vector<1x4x9xbf16>
    %65 = vector.shape_cast %64 : vector<1x4x9xbf16> to vector<4x9xbf16>
    %c0_49 = arith.constant 0 : index
    %c0_50 = arith.constant 0 : index
    %c0_51 = arith.constant 0 : index
    %66 = vector.load %arg10[%c0_49, %c0_50, %c0_51] : memref<6x9x128xbf16, #tpu.memory_space<vmem>>, vector<1x9x128xbf16>
    %67 = vector.shape_cast %66 : vector<1x9x128xbf16> to vector<9x128xbf16>
    %cst_52 = arith.constant dense<0.000000e+00> : vector<4x128xf32>
    %68 = tpu.matmul %65, %67, %cst_52 {dimension_numbers = #tpu.dot_dimension_numbers<[1], [0], [0], [1], [0, 0, 1, 1], [], []>} : vector<4x9xbf16>, vector<9x128xbf16>, vector<4x128xf32> -> vector<4x128xf32>
    %c1_53 = arith.constant 1 : index
    %c0_54 = arith.constant 0 : index
    %c0_55 = arith.constant 0 : index
    %69 = vector.load %arg6[%c1_53, %c0_54, %c0_55] : memref<3x4x9xbf16, #tpu.memory_space<vmem>>, vector<1x4x9xbf16>
    %70 = vector.shape_cast %69 : vector<1x4x9xbf16> to vector<4x9xbf16>
    %c1_56 = arith.constant 1 : index
    %c0_57 = arith.constant 0 : index
    %c0_58 = arith.constant 0 : index
    %71 = vector.load %arg10[%c1_56, %c0_57, %c0_58] : memref<6x9x128xbf16, #tpu.memory_space<vmem>>, vector<1x9x128xbf16>
    %72 = vector.shape_cast %71 : vector<1x9x128xbf16> to vector<9x128xbf16>
    %cst_59 = arith.constant dense<0.000000e+00> : vector<4x128xf32>
    %73 = tpu.matmul %70, %72, %cst_59 {dimension_numbers = #tpu.dot_dimension_numbers<[1], [0], [0], [1], [0, 0, 1, 1], [], []>} : vector<4x9xbf16>, vector<9x128xbf16>, vector<4x128xf32> -> vector<4x128xf32>
    %74 = arith.addf %68, %73 : vector<4x128xf32>
    %c2_60 = arith.constant 2 : index
    %c0_61 = arith.constant 0 : index
    %c0_62 = arith.constant 0 : index
    %75 = vector.load %arg6[%c2_60, %c0_61, %c0_62] : memref<3x4x9xbf16, #tpu.memory_space<vmem>>, vector<1x4x9xbf16>
    %76 = vector.shape_cast %75 : vector<1x4x9xbf16> to vector<4x9xbf16>
    %c2_63 = arith.constant 2 : index
    %c0_64 = arith.constant 0 : index
    %c0_65 = arith.constant 0 : index
    %77 = vector.load %arg10[%c2_63, %c0_64, %c0_65] : memref<6x9x128xbf16, #tpu.memory_space<vmem>>, vector<1x9x128xbf16>
    %78 = vector.shape_cast %77 : vector<1x9x128xbf16> to vector<9x128xbf16>
    %cst_66 = arith.constant dense<0.000000e+00> : vector<4x128xf32>
    %79 = tpu.matmul %76, %78, %cst_66 {dimension_numbers = #tpu.dot_dimension_numbers<[1], [0], [0], [1], [0, 0, 1, 1], [], []>} : vector<4x9xbf16>, vector<9x128xbf16>, vector<4x128xf32> -> vector<4x128xf32>
    %80 = arith.addf %74, %79 : vector<4x128xf32>
    %81 = vector.broadcast %62 : vector<4x1xf32> to vector<4x128xf32>
    %82 = arith.mulf %80, %81 : vector<4x128xf32>
    %83 = vector.broadcast %63 : vector<4x1xf32> to vector<4x128xf32>
    %84 = arith.addf %82, %83 : vector<4x128xf32>
    %cst_67 = arith.constant 0.000000e+00 : f32
    %85 = vector.broadcast %cst_67 : f32 to vector<4x128xf32>
    %86 = arith.maximumf %84, %85 : vector<4x128xf32>
    %87 = arith.truncf %86 : vector<4x128xf32> to vector<4x128xbf16>
    %c0_68 = arith.constant 0 : index
    %c0_69 = arith.constant 0 : index
    %c0_70 = arith.constant 0 : index
    %c0_71 = arith.constant 0 : index
    %88 = vector.load %arg9[%c0_68, %c0_69, %c0_70, %c0_71] : memref<1x4x4x128xbf16, #tpu.memory_space<vmem>>, vector<1x1x4x128xbf16>
    %89 = vector.shape_cast %88 : vector<1x1x4x128xbf16> to vector<4x128xbf16>
    %90 = vector.shape_cast %87 : vector<4x128xbf16> to vector<1x1x4x128xbf16>
    tpu.vector_store %arg9[%c0_68, %c0_69, %c0_70, %c0_71], %90 {strides = array<i32>} : memref<1x4x4x128xbf16, #tpu.memory_space<vmem>>, vector<1x1x4x128xbf16>,
    %c0_72 = arith.constant 0 : index
    %c0_73 = arith.constant 0 : index
    %c0_74 = arith.constant 0 : index
    %91 = vector.load %arg6[%c0_72, %c0_73, %c0_74] : memref<3x4x9xbf16, #tpu.memory_space<vmem>>, vector<1x4x9xbf16>
    %92 = vector.shape_cast %91 : vector<1x4x9xbf16> to vector<4x9xbf16>
    %c1_75 = arith.constant 1 : index
    %c0_76 = arith.constant 0 : index
    %c0_77 = arith.constant 0 : index
    %93 = vector.load %arg10[%c1_75, %c0_76, %c0_77] : memref<6x9x128xbf16, #tpu.memory_space<vmem>>, vector<1x9x128xbf16>
    %94 = vector.shape_cast %93 : vector<1x9x128xbf16> to vector<9x128xbf16>
    %cst_78 = arith.constant dense<0.000000e+00> : vector<4x128xf32>
    %95 = tpu.matmul %92, %94, %cst_78 {dimension_numbers = #tpu.dot_dimension_numbers<[1], [0], [0], [1], [0, 0, 1, 1], [], []>} : vector<4x9xbf16>, vector<9x128xbf16>, vector<4x128xf32> -> vector<4x128xf32>
    %c1_79 = arith.constant 1 : index
    %c0_80 = arith.constant 0 : index
    %c0_81 = arith.constant 0 : index
    %96 = vector.load %arg6[%c1_79, %c0_80, %c0_81] : memref<3x4x9xbf16, #tpu.memory_space<vmem>>, vector<1x4x9xbf16>
    %97 = vector.shape_cast %96 : vector<1x4x9xbf16> to vector<4x9xbf16>
    %c2_82 = arith.constant 2 : index
    %c0_83 = arith.constant 0 : index
    %c0_84 = arith.constant 0 : index
    %98 = vector.load %arg10[%c2_82, %c0_83, %c0_84] : memref<6x9x128xbf16, #tpu.memory_space<vmem>>, vector<1x9x128xbf16>
    %99 = vector.shape_cast %98 : vector<1x9x128xbf16> to vector<9x128xbf16>
    %cst_85 = arith.constant dense<0.000000e+00> : vector<4x128xf32>
    %100 = tpu.matmul %97, %99, %cst_85 {dimension_numbers = #tpu.dot_dimension_numbers<[1], [0], [0], [1], [0, 0, 1, 1], [], []>} : vector<4x9xbf16>, vector<9x128xbf16>, vector<4x128xf32> -> vector<4x128xf32>
    %101 = arith.addf %95, %100 : vector<4x128xf32>
    %c2_86 = arith.constant 2 : index
    %c0_87 = arith.constant 0 : index
    %c0_88 = arith.constant 0 : index
    %102 = vector.load %arg6[%c2_86, %c0_87, %c0_88] : memref<3x4x9xbf16, #tpu.memory_space<vmem>>, vector<1x4x9xbf16>
    %103 = vector.shape_cast %102 : vector<1x4x9xbf16> to vector<4x9xbf16>
    %c3_89 = arith.constant 3 : index
    %c0_90 = arith.constant 0 : index
    %c0_91 = arith.constant 0 : index
    %104 = vector.load %arg10[%c3_89, %c0_90, %c0_91] : memref<6x9x128xbf16, #tpu.memory_space<vmem>>, vector<1x9x128xbf16>
    %105 = vector.shape_cast %104 : vector<1x9x128xbf16> to vector<9x128xbf16>
    %cst_92 = arith.constant dense<0.000000e+00> : vector<4x128xf32>
    %106 = tpu.matmul %103, %105, %cst_92 {dimension_numbers = #tpu.dot_dimension_numbers<[1], [0], [0], [1], [0, 0, 1, 1], [], []>} : vector<4x9xbf16>, vector<9x128xbf16>, vector<4x128xf32> -> vector<4x128xf32>
    %107 = arith.addf %101, %106 : vector<4x128xf32>
    %108 = vector.broadcast %62 : vector<4x1xf32> to vector<4x128xf32>
    %109 = arith.mulf %107, %108 : vector<4x128xf32>
    %110 = vector.broadcast %63 : vector<4x1xf32> to vector<4x128xf32>
    %111 = arith.addf %109, %110 : vector<4x128xf32>
    %cst_93 = arith.constant 0.000000e+00 : f32
    %112 = vector.broadcast %cst_93 : f32 to vector<4x128xf32>
    %113 = arith.maximumf %111, %112 : vector<4x128xf32>
    %114 = arith.truncf %113 : vector<4x128xf32> to vector<4x128xbf16>
    %c0_94 = arith.constant 0 : index
    %c1_95 = arith.constant 1 : index
    %c0_96 = arith.constant 0 : index
    %c0_97 = arith.constant 0 : index
    %115 = vector.load %arg9[%c0_94, %c1_95, %c0_96, %c0_97] : memref<1x4x4x128xbf16, #tpu.memory_space<vmem>>, vector<1x1x4x128xbf16>
    %116 = vector.shape_cast %115 : vector<1x1x4x128xbf16> to vector<4x128xbf16>
    %117 = vector.shape_cast %114 : vector<4x128xbf16> to vector<1x1x4x128xbf16>
    tpu.vector_store %arg9[%c0_94, %c1_95, %c0_96, %c0_97], %117 {strides = array<i32>} : memref<1x4x4x128xbf16, #tpu.memory_space<vmem>>, vector<1x1x4x128xbf16>,
    %c0_98 = arith.constant 0 : index
    %c0_99 = arith.constant 0 : index
    %c0_100 = arith.constant 0 : index
    %118 = vector.load %arg6[%c0_98, %c0_99, %c0_100] : memref<3x4x9xbf16, #tpu.memory_space<vmem>>, vector<1x4x9xbf16>
    %119 = vector.shape_cast %118 : vector<1x4x9xbf16> to vector<4x9xbf16>
    %c2_101 = arith.constant 2 : index
    %c0_102 = arith.constant 0 : index
    %c0_103 = arith.constant 0 : index
    %120 = vector.load %arg10[%c2_101, %c0_102, %c0_103] : memref<6x9x128xbf16, #tpu.memory_space<vmem>>, vector<1x9x128xbf16>
    %121 = vector.shape_cast %120 : vector<1x9x128xbf16> to vector<9x128xbf16>
    %cst_104 = arith.constant dense<0.000000e+00> : vector<4x128xf32>
    %122 = tpu.matmul %119, %121, %cst_104 {dimension_numbers = #tpu.dot_dimension_numbers<[1], [0], [0], [1], [0, 0, 1, 1], [], []>} : vector<4x9xbf16>, vector<9x128xbf16>, vector<4x128xf32> -> vector<4x128xf32>
    %c1_105 = arith.constant 1 : index
    %c0_106 = arith.constant 0 : index
    %c0_107 = arith.constant 0 : index
    %123 = vector.load %arg6[%c1_105, %c0_106, %c0_107] : memref<3x4x9xbf16, #tpu.memory_space<vmem>>, vector<1x4x9xbf16>
    %124 = vector.shape_cast %123 : vector<1x4x9xbf16> to vector<4x9xbf16>
    %c3_108 = arith.constant 3 : index
    %c0_109 = arith.constant 0 : index
    %c0_110 = arith.constant 0 : index
    %125 = vector.load %arg10[%c3_108, %c0_109, %c0_110] : memref<6x9x128xbf16, #tpu.memory_space<vmem>>, vector<1x9x128xbf16>
    %126 = vector.shape_cast %125 : vector<1x9x128xbf16> to vector<9x128xbf16>
    %cst_111 = arith.constant dense<0.000000e+00> : vector<4x128xf32>
    %127 = tpu.matmul %124, %126, %cst_111 {dimension_numbers = #tpu.dot_dimension_numbers<[1], [0], [0], [1], [0, 0, 1, 1], [], []>} : vector<4x9xbf16>, vector<9x128xbf16>, vector<4x128xf32> -> vector<4x128xf32>
    %128 = arith.addf %122, %127 : vector<4x128xf32>
    %c2_112 = arith.constant 2 : index
    %c0_113 = arith.constant 0 : index
    %c0_114 = arith.constant 0 : index
    %129 = vector.load %arg6[%c2_112, %c0_113, %c0_114] : memref<3x4x9xbf16, #tpu.memory_space<vmem>>, vector<1x4x9xbf16>
    %130 = vector.shape_cast %129 : vector<1x4x9xbf16> to vector<4x9xbf16>
    %c4_115 = arith.constant 4 : index
    %c0_116 = arith.constant 0 : index
    %c0_117 = arith.constant 0 : index
    %131 = vector.load %arg10[%c4_115, %c0_116, %c0_117] : memref<6x9x128xbf16, #tpu.memory_space<vmem>>, vector<1x9x128xbf16>
    %132 = vector.shape_cast %131 : vector<1x9x128xbf16> to vector<9x128xbf16>
    %cst_118 = arith.constant dense<0.000000e+00> : vector<4x128xf32>
    %133 = tpu.matmul %130, %132, %cst_118 {dimension_numbers = #tpu.dot_dimension_numbers<[1], [0], [0], [1], [0, 0, 1, 1], [], []>} : vector<4x9xbf16>, vector<9x128xbf16>, vector<4x128xf32> -> vector<4x128xf32>
    %134 = arith.addf %128, %133 : vector<4x128xf32>
    %135 = vector.broadcast %62 : vector<4x1xf32> to vector<4x128xf32>
    %136 = arith.mulf %134, %135 : vector<4x128xf32>
    %137 = vector.broadcast %63 : vector<4x1xf32> to vector<4x128xf32>
    %138 = arith.addf %136, %137 : vector<4x128xf32>
    %cst_119 = arith.constant 0.000000e+00 : f32
    %139 = vector.broadcast %cst_119 : f32 to vector<4x128xf32>
    %140 = arith.maximumf %138, %139 : vector<4x128xf32>
    %141 = arith.truncf %140 : vector<4x128xf32> to vector<4x128xbf16>
    %c0_120 = arith.constant 0 : index
    %c2_121 = arith.constant 2 : index
    %c0_122 = arith.constant 0 : index
    %c0_123 = arith.constant 0 : index
    %142 = vector.load %arg9[%c0_120, %c2_121, %c0_122, %c0_123] : memref<1x4x4x128xbf16, #tpu.memory_space<vmem>>, vector<1x1x4x128xbf16>
    %143 = vector.shape_cast %142 : vector<1x1x4x128xbf16> to vector<4x128xbf16>
    %144 = vector.shape_cast %141 : vector<4x128xbf16> to vector<1x1x4x128xbf16>
    tpu.vector_store %arg9[%c0_120, %c2_121, %c0_122, %c0_123], %144 {strides = array<i32>} : memref<1x4x4x128xbf16, #tpu.memory_space<vmem>>, vector<1x1x4x128xbf16>,
    %c0_124 = arith.constant 0 : index
    %c0_125 = arith.constant 0 : index
    %c0_126 = arith.constant 0 : index
    %145 = vector.load %arg6[%c0_124, %c0_125, %c0_126] : memref<3x4x9xbf16, #tpu.memory_space<vmem>>, vector<1x4x9xbf16>
    %146 = vector.shape_cast %145 : vector<1x4x9xbf16> to vector<4x9xbf16>
    %c3_127 = arith.constant 3 : index
    %c0_128 = arith.constant 0 : index
    %c0_129 = arith.constant 0 : index
    %147 = vector.load %arg10[%c3_127, %c0_128, %c0_129] : memref<6x9x128xbf16, #tpu.memory_space<vmem>>, vector<1x9x128xbf16>
    %148 = vector.shape_cast %147 : vector<1x9x128xbf16> to vector<9x128xbf16>
    %cst_130 = arith.constant dense<0.000000e+00> : vector<4x128xf32>
    %149 = tpu.matmul %146, %148, %cst_130 {dimension_numbers = #tpu.dot_dimension_numbers<[1], [0], [0], [1], [0, 0, 1, 1], [], []>} : vector<4x9xbf16>, vector<9x128xbf16>, vector<4x128xf32> -> vector<4x128xf32>
    %c1_131 = arith.constant 1 : index
    %c0_132 = arith.constant 0 : index
    %c0_133 = arith.constant 0 : index
    %150 = vector.load %arg6[%c1_131, %c0_132, %c0_133] : memref<3x4x9xbf16, #tpu.memory_space<vmem>>, vector<1x4x9xbf16>
    %151 = vector.shape_cast %150 : vector<1x4x9xbf16> to vector<4x9xbf16>
    %c4_134 = arith.constant 4 : index
    %c0_135 = arith.constant 0 : index
    %c0_136 = arith.constant 0 : index
    %152 = vector.load %arg10[%c4_134, %c0_135, %c0_136] : memref<6x9x128xbf16, #tpu.memory_space<vmem>>, vector<1x9x128xbf16>
    %153 = vector.shape_cast %152 : vector<1x9x128xbf16> to vector<9x128xbf16>
    %cst_137 = arith.constant dense<0.000000e+00> : vector<4x128xf32>
    %154 = tpu.matmul %151, %153, %cst_137 {dimension_numbers = #tpu.dot_dimension_numbers<[1], [0], [0], [1], [0, 0, 1, 1], [], []>} : vector<4x9xbf16>, vector<9x128xbf16>, vector<4x128xf32> -> vector<4x128xf32>
    %155 = arith.addf %149, %154 : vector<4x128xf32>
    %c2_138 = arith.constant 2 : index
    %c0_139 = arith.constant 0 : index
    %c0_140 = arith.constant 0 : index
    %156 = vector.load %arg6[%c2_138, %c0_139, %c0_140] : memref<3x4x9xbf16, #tpu.memory_space<vmem>>, vector<1x4x9xbf16>
    %157 = vector.shape_cast %156 : vector<1x4x9xbf16> to vector<4x9xbf16>
    %c5_141 = arith.constant 5 : index
    %c0_142 = arith.constant 0 : index
    %c0_143 = arith.constant 0 : index
    %158 = vector.load %arg10[%c5_141, %c0_142, %c0_143] : memref<6x9x128xbf16, #tpu.memory_space<vmem>>, vector<1x9x128xbf16>
    %159 = vector.shape_cast %158 : vector<1x9x128xbf16> to vector<9x128xbf16>
    %cst_144 = arith.constant dense<0.000000e+00> : vector<4x128xf32>
    %160 = tpu.matmul %157, %159, %cst_144 {dimension_numbers = #tpu.dot_dimension_numbers<[1], [0], [0], [1], [0, 0, 1, 1], [], []>} : vector<4x9xbf16>, vector<9x128xbf16>, vector<4x128xf32> -> vector<4x128xf32>
    %161 = arith.addf %155, %160 : vector<4x128xf32>
    %162 = vector.broadcast %62 : vector<4x1xf32> to vector<4x128xf32>
    %163 = arith.mulf %161, %162 : vector<4x128xf32>
    %164 = vector.broadcast %63 : vector<4x1xf32> to vector<4x128xf32>
    %165 = arith.addf %163, %164 : vector<4x128xf32>
    %cst_145 = arith.constant 0.000000e+00 : f32
    %166 = vector.broadcast %cst_145 : f32 to vector<4x128xf32>
    %167 = arith.maximumf %165, %166 : vector<4x128xf32>
    %168 = arith.truncf %167 : vector<4x128xf32> to vector<4x128xbf16>
    %c0_146 = arith.constant 0 : index
    %c3_147 = arith.constant 3 : index
    %c0_148 = arith.constant 0 : index
    %c0_149 = arith.constant 0 : index
    %169 = vector.load %arg9[%c0_146, %c3_147, %c0_148, %c0_149] : memref<1x4x4x128xbf16, #tpu.memory_space<vmem>>, vector<1x1x4x128xbf16>
    %170 = vector.shape_cast %169 : vector<1x1x4x128xbf16> to vector<4x128xbf16>
    %171 = vector.shape_cast %168 : vector<4x128xbf16> to vector<1x1x4x128xbf16>
    tpu.vector_store %arg9[%c0_146, %c3_147, %c0_148, %c0_149], %171 {strides = array<i32>} : memref<1x4x4x128xbf16, #tpu.memory_space<vmem>>, vector<1x1x4x128xbf16>,
    return
  }
  func.func @transform_0(%arg0: i32, %arg1: i32) -> (i32, i32, i32, i32) {
    %c0_i32 = arith.constant 0 : i32
    %c0_i32_0 = arith.constant 0 : i32
    %c0_i32_1 = arith.constant 0 : i32
    return %arg0, %c0_i32, %c0_i32_0, %arg1 : i32, i32, i32, i32
  }
  func.func @transform_1(%arg0: i32, %arg1: i32) -> (i32, i32) {
    %c0_i32 = arith.constant 0 : i32
    %c0_i32_0 = arith.constant 0 : i32
    %c0_i32_1 = arith.constant 0 : i32
    return %c0_i32, %c0_i32_0 : i32, i32
  }
  func.func @transform_2(%arg0: i32, %arg1: i32) -> (i32, i32) {
    %c0_i32 = arith.constant 0 : i32
    %c0_i32_0 = arith.constant 0 : i32
    %c0_i32_1 = arith.constant 0 : i32
    return %c0_i32, %c0_i32_0 : i32, i32
  }
  func.func @transform_3(%arg0: i32, %arg1: i32) -> (i32, i32) {
    %c0_i32 = arith.constant 0 : i32
    %c0_i32_0 = arith.constant 0 : i32
    %c0_i32_1 = arith.constant 0 : i32
    return %c0_i32, %c0_i32_0 : i32, i32
  }
  func.func @transform_4(%arg0: i32, %arg1: i32) -> (i32, i32, i32) {
    %c0_i32 = arith.constant 0 : i32
    %c0_i32_0 = arith.constant 0 : i32
    %c0_i32_1 = arith.constant 0 : i32
    %c0_i32_2 = arith.constant 0 : i32
    return %c0_i32, %c0_i32_0, %c0_i32_1 : i32, i32, i32
  }
  func.func @transform_5(%arg0: i32, %arg1: i32) -> (i32, i32) {
    %c0_i32 = arith.constant 0 : i32
    %c0_i32_0 = arith.constant 0 : i32
    %c0_i32_1 = arith.constant 0 : i32
    return %c0_i32, %c0_i32_0 : i32, i32
  }
  func.func @transform_6(%arg0: i32, %arg1: i32) -> (i32, i32) {
    %c0_i32 = arith.constant 0 : i32
    %c0_i32_0 = arith.constant 0 : i32
    %c0_i32_1 = arith.constant 0 : i32
    return %c0_i32, %c0_i32_0 : i32, i32
  }
  func.func @transform_7(%arg0: i32, %arg1: i32) -> (i32, i32, i32, i32) {
    %c0_i32 = arith.constant 0 : i32
    %c0_i32_0 = arith.constant 0 : i32
    %c0_i32_1 = arith.constant 0 : i32
    return %arg0, %c0_i32, %c0_i32_0, %arg1 : i32, i32, i32, i32
  }
}

</mosaic_0001>

<bundles_post_ra>
// kernel: tpu_custom_call.1
= control target key start
LH: loop header
LB: loop body
LE: loop exit
PB: predicated region body
PF: predicated region fallthrough
CT: control target
= control target key end

     0   :  { %12 = vsyncpa [#allocation4], 0  ;;  %s2265_s0 = inlined_call_operand.vmem [shape: bf16[2,4,36,128], index: 0, kind: input, shape index: {}]   ;;  %s2266_s1 = inlined_call_operand.vmem [shape: bf16[9,36], index: 1, kind: input, shape index: {}]   ;;  %s2267_s2 = inlined_call_operand.vmem [shape: f32[9,1], index: 2, kind: input, shape index: {}]   ;;  %s2268_s3 = inlined_call_operand.vmem [shape: f32[9,1], index: 3, kind: input, shape index: {}]   ;;  %s2269_s4 = inlined_call_operand.vmem [shape: bf16[3,4,9], index: 4, kind: input, shape index: {}]   ;;  %s2270_s5 = inlined_call_operand.vmem [shape: f32[4,1], index: 5, kind: input, shape index: {}]   ;;  %s2271_s6 = inlined_call_operand.vmem [shape: f32[4,1], index: 6, kind: input, shape index: {}]   ;;  %s2272_s7 = inlined_call_operand.hbm [shape: bf16[2,4,4,128], index: 7, kind: output, shape index: {}]  }
   0x1   :  { %14 = vsyncpa [#allocation4 + $0x1], 0  ;;  %s1969_s24 = smov 0   ;;  %s1971_s25 = smov 0  }
   0x2   :  { %s1973_s26 = smov 0   ;;  %s1975_s27 = smov 0  }
   0x3   :  { %s1977_s28 = smov 0   ;;  %s1979_s29 = smov 0  }
   0x4 LB: > { %s1473_s30 = sadd.s32 4294967295, %s1920_s29   ;;  %s1474_s8 = sadd.s32 4294967294, %s1920_s29   ;;  %s1920_s29 = sphi %s1979_s29, %s20_s29   ;;  %s1916_s28 = sphi %s1977_s28, %s2281_s28   ;;  %s1912_s27 = sphi %s1975_s27, %s2280_s27   ;;  %s1908_s26 = sphi %s1973_s26, %s2279_s26   ;;  %s1904_s25 = sphi %s1971_s25, %s2278_s25   ;;  %s1900_s24 = sphi %s1969_s24, %s2277_s24  }
   0x5   : > { %s32_s9 = sadd.s32 1, %s1916_s28  ;;  %s195_s10 = sadd.s32 1, %s1908_s26 }
   0x6   : > { %p34_p0 = scmp.ge.s32.totalorder %s32_s9, 2  ;;  %p205_p1 = scmp.ne.s32.totalorder %s1908_s26, %s1904_s25 }
   0x7   : > { %p206_p2 = scmp.eq.s32.totalorder %s1473_s30, 1  ;;  %p211_p3 = scmp.ne.s32.totalorder %s1904_s25, %s1900_s24 }
   0x8   : > { %s2283_s9 = smov (%p34_p0, %s32_s9), 0  ;;  %p212_p5 = scmp.eq.s32.totalorder %s1474_s8, 1 }
   0x9   : > { %p2009_p4 = por %p206_p2, %p205_p1  ;;  %s190_s12 = ssub.s32 %s1916_s28, %s2283_s9 }
   0xa   : > { %p1477_p6 = scmp.ge.s32.totalorder %s1920_s29, 1  ;;  %p193_p7 = scmp.eq.s32.totalorder %s190_s12, 0 }
   0xb   : > { %p2016_p8 = por %p212_p5, %p211_p3  ;;  %p259_p9 = scmp.lt.s32.totalorder %s1920_s29, 3 }
   0xc   : > { %s2022_s14 = scalar_select %p193_p7, %s1908_s26, %s195_s10  }
   0xd   : > { %p260_p10 = pnand %p1477_p6, %p259_p9 }
   0xe   : > { %p294_p11 = scmp.lt.s32.totalorder (!%p260_p10), %s1912_s27, 1  ;;  %v1922_v0 = vmov (!%p260_p10), 0.0   ;;  %vm1923_vm0 = vmmov (!%p260_p10), 0   ;;  %v1924_v1 = vmov (!%p260_p10), 0   ;;  %v318_v2 = vld [vmem:[%s2267_s2 + $0x8] sm:$0x1] (!%p260_p10) }
   0xf   : > { %263 = sbr.rel (%p260_p10) target bundleno = 566 (0x236), region = 48  ;;  %1609 = vmatprep.subr.bf16.mxu0 (!%p260_p10), %v1922_v0  ;;  %1619 = vmatprep.subr.bf16.mxu1 (!%p260_p10), %v1922_v0  ;;  %303 = vst [vmem:[#allocation2] sm:$0xf] (!%p260_p10), %v1924_v1  ;;  %311 = vst [vmem:[#allocation2 + $0x28] sm:$0xf] (!%p260_p10), %v1924_v1  ;;  %v317_v4 = vld [vmem:[%s2267_s2] sm:$0xff] (!%p260_p10) }
  0x10   : > { %1615 = vmatprep.mubr.msk.bf16.mxu0 (!%p260_p10), %vm1923_vm0, %v1922_v0  ;;  %1625 = vmatprep.mubr.msk.bf16.mxu1 (!%p260_p10), %vm1923_vm0, %v1922_v0  ;;  %v320_v3 = vld [vmem:[%s2268_s3 + $0x8] sm:$0x1] (!%p260_p10)  ;;  %v319_v5 = vld [vmem:[%s2268_s3] sm:$0xff] (!%p260_p10)  ;;  %vm350_vm1 = vcmask (!%p260_p10), 1041408   ;;  %vm346_vm2 = vcmask (!%p260_p10), 293888   ;;  %vm304_vm3 = vcmask (!%p260_p10), 1040384  }
  0x11   : > { %1815 = vset.pattern.permute.xlu0 (!%p260_p10), %v1924_v1  ;;  %1816 = vset.pattern.permute.xlu1 (!%p260_p10), %v1924_v1  ;;  %v686_v7 = vld [vmem:[%s2270_s5] sm:$0xf] (!%p260_p10)  ;;  %vm305_vm4 = vsmask.f32 (!%p260_p10), 256  ;;  %v307_v25 = vld [vmem:[#allocation2 + $0x4] sm:$0x1] (!%p260_p10) }
  0x12   : > { %402 = vperm.xlu0 (!%p260_p10), %1815, %v318_v2   ;;  %414 = vperm.xlu1 (!%p260_p10), %1816, %v320_v3   ;;  %v687_v8 = vld [vmem:[%s2271_s6] sm:$0xf] (!%p260_p10)  ;;  %vm2098_vm5 = vmand (!%p260_p10), %vm304_vm3, %vm305_vm4  ;;  %v312_v27 = vld [vmem:[#allocation2 + $0x2c] sm:$0x1] (!%p260_p10)  ;;  %vm704_vm6 = vcmask (!%p260_p10), 1043456   ;;  %vm705_vm7 = vcmask (!%p260_p10), 1044480  }
  0x13   : > { %v1823_v16 = vld [vmem:[%s2266_s1] sm:$0x1f] (!%p260_p10)   ;;  %v308_v28 = vsel (!%p260_p10), %vm2098_vm5, 0, %v307_v25  ;;  %v313_v29 = vsel (!%p260_p10), %vm2098_vm5, 0, %v312_v27  ;;  %v431_v55 = vld [vmem:[#allocation2 + $0xc] sm:$0x1] (!%p260_p10) }
  0x14   : > { %309 = vst [vmem:[#allocation2 + $0x4] sm:$0x1] (!%p260_p10), %v308_v28  ;;  %314 = vst [vmem:[#allocation2 + $0x2c] sm:$0x1] (!%p260_p10), %v313_v29  ;;  %v515_v58 = vld [vmem:[#allocation2 + $0x14] sm:$0x1] (!%p260_p10) }
  0x15   : > { %vm700_vm8 = vcmask (!%p260_p10), 72704   ;;  %s291_s19 = sand.u32 (!%p260_p10), 1, %s1904_s25   ;;  %s1568_s23 = sshll.u32 (!%p260_p10), %s1912_s27, 7 }
  0x16   : > { %s295_s15 = scalar_select %p294_p11, %s1912_s27, 1  ;;  %397 = vperm.xlu0 %1815, %v317_v4   ;;  %409 = vperm.xlu1 %1816, %v319_v5  }
  0x17   : > { %s2215_s10 = scalar_lea.hbm %s2272_s7, %s1568_s23  ;;  %s1926_s27 = smov [#allocation3]  }
  0x18   : > { %s1753_s20 = smul.u32 80, %s295_s15  ;;  %s1846_s16 = sshll.u32 %s1926_s27, 4  ;;  %s1847_s16 = int_to_ptr.vmem [resolvable:$false] %s1846_s16 }
  0x19   : > { %s1848_s17 = scalar_lea.vmem %s1847_s16, 256 }
  0x1a   : > { %s2047_s12 = scalar_lea.vmem %s2265_s0, %s1753_s20  ;;  %860 = vperm.xlu0 %1815, %v686_v7   ;;  %866 = vperm.xlu1 %1816, %v687_v8   ;;  %s1478_s20 = sshll.u32 %s291_s19, 3 }
  0x1b   : > { %v1817_v6 = vld [vmem:[%s2047_s12] sm:$0xff]   ;;  %v1818_v9 = vld [vmem:[%s2047_s12 + $0x14] sm:$0xff]   ;;  %v1819_v10 = vld [vmem:[%s2047_s12 + $0x8] sm:$0xff]   ;;  %s293_s21 = scalar_lea.vmem [#allocation3], %s1478_s20 }
  0x1c   : > { %1610 = vmatpush3.bf16.msra.mxu0 %v1817_v6  ;;  %1620 = vmatpush3.bf16.msra.mxu1 %v1818_v9  ;;  %v1820_v11 = vld [vmem:[%s2047_s12 + $0x1c] sm:$0xff]   ;;  %v1821_v12 = vld [vmem:[%s2047_s12 + $0x10] ss:$0 sps:$4 sm:$0x33]   ;;  %v1824_v17 = vld [vmem:[%s2047_s12 + $0x28] sm:$0xff]   ;;  %s1395_s22 = sshll.u32 %s293_s21, 4  ;;  %s2210_s22 = int_to_ptr.vmem [resolvable:$true] %s1395_s22 }
  0x1d   : > { %1611 = vmatprep.subr.bf16.mxu0 %v1922_v0  ;;  %1621 = vmatprep.subr.bf16.mxu1 %v1922_v0  ;;  %v1822_v13 = vld [vmem:[%s2047_s12 + $0x24] ss:$0 sps:$4 sm:$0x33]   ;;  %v352_v14 = vsel %vm350_vm1, %v1821_v12, 0  ;;  %v1825_v18 = vld [vmem:[%s2047_s12 + $0x3c] sm:$0xff]   ;;  %v1826_v19 = vld [vmem:[%s2047_s12 + $0x30] sm:$0xff]   ;;  %p1849_p1 = scmp.lt.s32.totalorder %s2210_s22, %s1847_s16 }
  0x1e   : > { %v456_v15 = vsel %vm350_vm1, %v1822_v13, 0  ;;  %v1827_v20 = vld [vmem:[%s2047_s12 + $0x44] sm:$0xff]   ;;  %v1828_v21 = vld [vmem:[%s2047_s12 + $0x38] ss:$0 sps:$4 sm:$0x33]   ;;  %s1842_s15 = scalar_lea.vmem %s2210_s22, 128 }
  0x1f   : > { %v1829_v22 = vld [vmem:[%s2047_s12 + $0x4c] ss:$0 sps:$4 sm:$0x33]   ;;  %v540_v23 = vsel %vm350_vm1, %v1828_v21, 0  ;;  %v1833_v21 = vld [vmem:[#allocation2] sm:$0x1f]   ;;  %p1843_p12 = scmp.ne.s32.totalorder %s2210_s22, %s1842_s15  ;;  %p1850_p2 = scmp.lt.s32.totalorder %s1848_s17, %s1842_s15 }
  0x20   : > { %1612 = vmatpush3.bf16.msra.mxu0 %v1819_v10  ;;  %1622 = vmatpush3.bf16.msra.mxu1 %v1820_v11  ;;  %v624_v24 = vsel %vm350_vm1, %v1829_v22, 0  ;;  %v1925_v10 = vmov 65535   ;;  %s2219_s12 = scalar_lea.sflag [#allocation4], %s291_s19 }
  0x21   : > { %1613 = vmatprep.subr.bf16.mxu0 %v1922_v0  ;;  %1623 = vmatprep.subr.bf16.mxu1 %v1922_v0  ;;  %v706_v11 = vsel %vm704_vm6, 4294967295, %v1925_v10  ;;  %p1844_p13 = pnand %p1843_p12, %p2009_p4  ;;  %p1851_p3 = por %p1850_p2, %p1849_p1 }
  0x23   : > { %p1845_p0 = pneg %p1844_p13 }
  0x24   : > { %1614 = vmatpush3.bf16.msra.mxu0 %v352_v14  ;;  %1624 = vmatpush3.bf16.msra.mxu1 %v456_v15 }
  0x25   : > { %1629 = vmatprep.subr.bf16.mxu0 %v1922_v0  ;;  %1639 = vmatprep.subr.bf16.mxu1 %v1922_v0  ;;  %p1852_p5 = pnand %p1851_p3, %p1845_p0 }
  0x27   : > { %1616 = vmatmul.mubr.msk.bf16.vlgmr.msra.gmra.mrb[0].mxu0 %vm346_vm2, %v1823_v16  ;;  %1626 = vmatmul.mubr.msk.bf16.vlgmr.msra.gmra.mrb[0].mxu1 %vm346_vm2, %v1823_v16 }
  0x28   : > { %1630 = vmatpush3.bf16.msra.mxu0 %v1824_v17  ;;  %1640 = vmatpush3.bf16.msra.mxu1 %v1825_v18  ;;  %v599_v18 = vld [vmem:[#allocation2 + $0x1c] sm:$0x1] }
  0x29   : > { %1631 = vmatprep.subr.bf16.mxu0 %v1922_v0  ;;  %1641 = vmatprep.subr.bf16.mxu1 %v1922_v0 }
  0x2a   : > { %1635 = vmatprep.mubr.msk.bf16.mxu0 %vm1923_vm0, %v1922_v0  ;;  %1645 = vmatprep.mubr.msk.bf16.mxu1 %vm1923_vm0, %v1922_v0 }
  0x2c   : > { %1632 = vmatpush3.bf16.msra.mxu0 %v1826_v19  ;;  %1642 = vmatpush3.bf16.msra.mxu1 %v1827_v20  ;;  %v2110_v20 = vsel %vm705_vm7, %v706_v11, 0 }
  0x2d   : > { %1633 = vmatprep.subr.bf16.mxu0 %v1922_v0  ;;  %1643 = vmatprep.subr.bf16.mxu1 %v1922_v0 }
  0x30   : > { %1634 = vmatpush3.bf16.msra.mxu0 %v540_v23  ;;  %1644 = vmatpush3.bf16.msra.mxu1 %v624_v24 }
  0x31   : > { %1649 = vmatprep.subr.bf16.mxu0 %v1922_v0  ;;  %1667 = vmatprep.subr.bf16.mxu1 %v1922_v0 }
  0x33   : > { %1636 = vmatmul.mubr.msk.bf16.vlgmr.msra.gmra.mrb[4].mxu0 %vm346_vm2, %v1823_v16  ;;  %1646 = vmatmul.mubr.msk.bf16.vlgmr.msra.gmra.mrb[4].mxu1 %vm346_vm2, %v1823_v16 }
  0x34   : > { %1651 = vmatprep.mubr.msk.bf16.mxu0 %vm1923_vm0, %v1922_v0  ;;  %1669 = vmatprep.mubr.msk.bf16.mxu1 %vm1923_vm0, %v1922_v0 }
  0x91   : > { %v403_v30 = vpop.permute.xlu0 %402  ;;  %v415_v31 = vpop.permute.xlu1 %414 }
  0x95   : > { %v398_v32 = vpop.permute.xlu0 %397  ;;  %v410_v33 = vpop.permute.xlu1 %409 }
  0xfa   : > { %v388_v34 = vpop.f32.mrb[0].mxu0  ;;  %v492_v36 = vpop.f32.mrb[0].mxu1 }
  0xfb   : > { %v405_v35 = vmul.f32 %v398_v32, %v388_v34  ;;  %v1617_v37 = vpop.f32.mrb[1].mxu0  ;;  %v499_v38 = vmul.f32 %v492_v36, %v398_v32  ;;  %v1627_v39 = vpop.f32.mrb[1].mxu1  ;;  %v1520_v36 = vld [vmem:[%s2269_s4 + $0x2] sm:$0x3] }
  0xfc   : > { %v391_v40 = vpop.f32.mrb[2].mxu0  ;;  %v495_v43 = vpop.f32.mrb[2].mxu1  ;;  %v760_v37 = vand.u32 %v1833_v21, %v2110_v20  ;;  %v1528_v39 = vld [vmem:[%s2269_s4 + $0x2] sm:$0x3] }
  0xfd   : > { %v417_v41 = vadd.f32 %v410_v33, %v405_v35  ;;  %v406_v42 = vmul.f32 %v403_v30, %v391_v40  ;;  %v1618_v44 = vpop.f32.mrb[3].mxu0  ;;  %v501_v45 = vadd.f32 %v499_v38, %v410_v33  ;;  %v500_v46 = vmul.f32 %v495_v43, %v403_v30  ;;  %v1628_v47 = vpop.f32.mrb[3].mxu1  ;;  %v873_v43 = vld [vmem:[%s2269_s4] sm:$0x3] }
  0xff   : > { %v419_v48 = vmax.f32 %v417_v41, 0.0  ;;  %v418_v49 = vadd.f32 %v415_v31, %v406_v42  ;;  %v503_v50 = vmax.f32 %v501_v45, 0.0  ;;  %v502_v51 = vadd.f32 %v500_v46, %v415_v31  ;;  %v688_v42 = vld [vmem:[%s2269_s4] sm:$0x3] }
 0x101   : > { %v1560_v52 = vpack.c.bf16 %v419_v48, %v419_v48  ;;  %v420_v53 = vmax.f32 %v418_v49, 0.0  ;;  %v1562_v54 = vpack.c.bf16 %v503_v50, %v503_v50  ;;  %v504_v56 = vmax.f32 %v502_v51, 0.0  ;;  %v1525_v48 = vld [vmem:[%s2269_s4 + $0x4] sm:$0x3] }
 0x102   : > { %v1533_v49 = vld [vmem:[%s2269_s4 + $0x4] sm:$0x3] }
 0x103   : > { %430 = vst [vmem:[#allocation2 + $0x8] sm:$0xf] %v1560_v52  ;;  %v1561_v57 = vpack.c.bf16 %v420_v53, %v420_v53  ;;  %514 = vst [vmem:[#allocation2 + $0x10] sm:$0xf] %v1562_v54  ;;  %v1563_v59 = vpack.c.bf16 %v504_v56, %v504_v56  ;;  %v1537_v54 = vld [vmem:[%s2269_s4 + $0x2] sm:$0x3] }
 0x105   : > { %v432_v60 = vsel %vm2098_vm5, %v1561_v57, %v431_v55  ;;  %v516_v61 = vsel %vm2098_vm5, %v1563_v59, %v515_v58  ;;  %v1546_v55 = vld [vmem:[%s2269_s4 + $0x2] sm:$0x3]  ;;  %v1841_v58 = vld [vmem:[#allocation2 + $0x28] sm:$0x1f]  }
 0x106   : > { %433 = vst [vmem:[#allocation2 + $0xc] sm:$0x1] %v432_v60  ;;  %v576_v62 = vpop.f32.mrb[4].mxu0  ;;  %517 = vst [vmem:[#allocation2 + $0x14] sm:$0x1] %v516_v61  ;;  %v660_v1 = vpop.f32.mrb[4].mxu1 }
 0x107   : > { %v583_v63 = vmul.f32 %v576_v62, %v398_v32  ;;  %v1637_v2 = vpop.f32.mrb[5].mxu0  ;;  %v667_v3 = vmul.f32 %v660_v1, %v398_v32  ;;  %v1647_v4 = vpop.f32.mrb[5].mxu1  ;;  %v683_v32 = vld [vmem:[#allocation2 + $0x24] sm:$0x1]  ;;  %v1042_v60 = vld [vmem:[%s2269_s4] sm:$0x3]  ;;  %v1331_v62 = vand.u32 %v1841_v58, %v2110_v20 }
 0x108   : > { %v579_v5 = vpop.f32.mrb[6].mxu0  ;;  %v663_v8 = vpop.f32.mrb[6].mxu1  ;;  %v1211_v61 = vld [vmem:[%s2269_s4] sm:$0x3]  ;;  %v1542_v1 = vld [vmem:[%s2269_s4 + $0x4] sm:$0x3] }
 0x109   : > { %v585_v6 = vadd.f32 %v583_v63, %v410_v33  ;;  %v584_v7 = vmul.f32 %v579_v5, %v403_v30  ;;  %v1638_v9 = vpop.f32.mrb[7].mxu0  ;;  %v669_v12 = vadd.f32 %v667_v3, %v410_v33  ;;  %v668_v13 = vmul.f32 %v663_v8, %v403_v30  ;;  %v1648_v14 = vpop.f32.mrb[7].mxu1  ;;  %v1551_v2 = vld [vmem:[%s2269_s4 + $0x4] sm:$0x3] }
 0x10a   : > { %v861_v3 = vpop.permute.xlu0 %860  ;;  %v867_v4 = vpop.permute.xlu1 %866 }
 0x10b   : > { %v587_v15 = vmax.f32 %v585_v6, 0.0  ;;  %v586_v16 = vadd.f32 %v584_v7, %v415_v31  ;;  %v671_v17 = vmax.f32 %v669_v12, 0.0  ;;  %v670_v19 = vadd.f32 %v668_v13, %v415_v31 }
 0x10d   : > { %v1564_v22 = vpack.c.bf16 %v587_v15, %v587_v15  ;;  %v588_v23 = vmax.f32 %v586_v16, 0.0  ;;  %v1830_v24 = vld [vmem:[#allocation2 + $0x8] sm:$0x1f]   ;;  %v1566_v25 = vpack.c.bf16 %v671_v17, %v671_v17  ;;  %v672_v27 = vmax.f32 %v670_v19, 0.0  ;;  %v1831_v28 = vld [vmem:[#allocation2 + $0x10] sm:$0x1f]  }
 0x10e   : > { %v709_v30 = vand.u32 %v1830_v24, %v2110_v20  ;;  %v888_v34 = vand.u32 %v1831_v28, %v2110_v20  ;;  %v1832_v35 = vld [vmem:[#allocation2 + $0x8] sm:$0x1f]   ;;  %v1834_v26 = vld [vmem:[#allocation2 + $0x10] sm:$0x1f]  }
 0x10f   : > { %598 = vst [vmem:[#allocation2 + $0x18] sm:$0xf] %v1564_v22  ;;  %v1565_v29 = vpack.c.bf16 %v588_v23, %v588_v23  ;;  %682 = vst [vmem:[#allocation2 + $0x20] sm:$0xf] %v1566_v25  ;;  %v1567_v33 = vpack.c.bf16 %v672_v27, %v672_v27  ;;  %v939_v40 = vand.u32 %v1832_v35, %v2110_v20  ;;  %v1838_v52 = vld [vmem:[#allocation2 + $0x10] sm:$0x1f]  }
 0x110   : > { %1650 = vmatpush3.bf16.msra.mxu0 %v709_v30  ;;  %1668 = vmatpush3.bf16.msra.mxu1 %v888_v34  ;;  %v815_v44 = vand.u32 %v1834_v26, %v2110_v20  ;;  %v1108_v56 = vand.u32 %v1838_v52, %v2110_v20 }
 0x111   : > { %v600_v31 = vsel %vm2098_vm5, %v1565_v29, %v599_v18  ;;  %v684_v38 = vsel %vm2098_vm5, %v1567_v33, %v683_v32  ;;  %1655 = vmatprep.subr.bf16.mxu0 %v1922_v0  ;;  %1673 = vmatprep.subr.bf16.mxu1 %v1922_v0 }
 0x112   : > { %601 = vst [vmem:[#allocation2 + $0x1c] sm:$0x1] %v600_v31  ;;  %685 = vst [vmem:[#allocation2 + $0x24] sm:$0x1] %v684_v38 }
 0x113   : > { %1652 = vmatmul.mubr.msk.bf16.vlgmr.msra.gmra.mrb[8].mxu0 %vm700_vm8, %v1520_v36  ;;  %1670 = vmatmul.mubr.msk.bf16.vlgmr.msra.gmra.mrb[8].mxu1 %vm700_vm8, %v1528_v39 }
 0x114   : > { %1656 = vmatpush3.bf16.msra.mxu0 %v760_v37  ;;  %1674 = vmatpush3.bf16.msra.mxu1 %v939_v40 }
 0x115   : > { %1657 = vmatprep.mubr.msk.bf16.mxu0 %vm1923_vm0, %v1922_v0  ;;  %1661 = vmatprep.subr.bf16.mxu0 %v1922_v0 }
 0x116   : > { %1675 = vmatprep.mubr.msk.bf16.mxu1 %vm1923_vm0, %v1922_v0  ;;  %1679 = vmatprep.subr.bf16.mxu1 %v1922_v0 }
 0x119   : > { %v1835_v41 = vld [vmem:[#allocation2 + $0x18] sm:$0x1f]   ;;  %v1837_v47 = vld [vmem:[#allocation2 + $0x20] sm:$0x1f]  }
 0x11a   : > { %v993_v45 = vand.u32 %v1835_v41, %v2110_v20  ;;  %v1836_v46 = vld [vmem:[#allocation2 + $0x18] sm:$0x1f]   ;;  %v1226_v51 = vand.u32 %v1837_v47, %v2110_v20  ;;  %v1840_v59 = vld [vmem:[#allocation2 + $0x20] sm:$0x1f]  }
 0x11b   : > { %v1057_v50 = vand.u32 %v1836_v46, %v2110_v20  ;;  %v1839_v53 = vld [vmem:[#allocation2 + $0x18] sm:$0x1f]   ;;  %v1162_v63 = vand.u32 %v1840_v59, %v2110_v20 }
 0x11c   : > { %v1277_v57 = vand.u32 %v1839_v53, %v2110_v20 }
 0x11f   : > { %1658 = vmatmul.mubr.msk.bf16.vlgmr.msra.gmra.mrb[8].mxu0 %vm700_vm8, %v688_v42  ;;  %1676 = vmatmul.mubr.msk.bf16.vlgmr.msra.gmra.mrb[8].mxu1 %vm700_vm8, %v873_v43 }
 0x120   : > { %1662 = vmatpush3.bf16.msra.mxu0 %v815_v44  ;;  %1680 = vmatpush3.bf16.msra.mxu1 %v993_v45 }
 0x121   : > { %1663 = vmatprep.mubr.msk.bf16.mxu0 %vm1923_vm0, %v1922_v0  ;;  %1681 = vmatprep.mubr.msk.bf16.mxu1 %vm1923_vm0, %v1922_v0 }
 0x122   : > { %1685 = vmatprep.subr.bf16.mxu0 %v1922_v0  ;;  %1703 = vmatprep.subr.bf16.mxu1 %v1922_v0 }
 0x12b   : > { %1664 = vmatmul.mubr.msk.bf16.vlgmr.msra.gmra.mrb[8].mxu0 %vm700_vm8, %v1525_v48  ;;  %1682 = vmatmul.mubr.msk.bf16.vlgmr.msra.gmra.mrb[8].mxu1 %vm700_vm8, %v1533_v49 }
 0x12c   : > { %1686 = vmatpush3.bf16.msra.mxu0 %v1057_v50  ;;  %1704 = vmatpush3.bf16.msra.mxu1 %v1226_v51 }
 0x12d   : > { %1687 = vmatprep.mubr.msk.bf16.mxu0 %vm1923_vm0, %v1922_v0  ;;  %1691 = vmatprep.subr.bf16.mxu0 %v1922_v0 }
 0x12e   : > { %1705 = vmatprep.mubr.msk.bf16.mxu1 %vm1923_vm0, %v1922_v0  ;;  %1709 = vmatprep.subr.bf16.mxu1 %v1922_v0 }
 0x133   : > { %1688 = vmatmul.mubr.msk.bf16.vlgmr.msra.gmra.mrb[12].mxu0 %vm700_vm8, %v1537_v54  ;;  %1706 = vmatmul.mubr.msk.bf16.vlgmr.msra.gmra.mrb[12].mxu1 %vm700_vm8, %v1546_v55 }
 0x134   : > { %1692 = vmatpush3.bf16.msra.mxu0 %v1108_v56  ;;  %1710 = vmatpush3.bf16.msra.mxu1 %v1277_v57 }
 0x135   : > { %1693 = vmatprep.mubr.msk.bf16.mxu0 %vm1923_vm0, %v1922_v0  ;;  %1697 = vmatprep.subr.bf16.mxu0 %v1922_v0 }
 0x136   : > { %1711 = vmatprep.mubr.msk.bf16.mxu1 %vm1923_vm0, %v1922_v0  ;;  %1715 = vmatprep.subr.bf16.mxu1 %v1922_v0 }
 0x13f   : > { %1694 = vmatmul.mubr.msk.bf16.vlgmr.msra.gmra.mrb[12].mxu0 %vm700_vm8, %v1042_v60  ;;  %1712 = vmatmul.mubr.msk.bf16.vlgmr.msra.gmra.mrb[12].mxu1 %vm700_vm8, %v1211_v61 }
 0x140   : > { %1698 = vmatpush3.bf16.msra.mxu0 %v1162_v63  ;;  %1716 = vmatpush3.bf16.msra.mxu1 %v1331_v62 }
 0x141   : > { %1699 = vmatprep.mubr.msk.bf16.mxu0 %vm1923_vm0, %v1922_v0  ;;  %1717 = vmatprep.mubr.msk.bf16.mxu1 %vm1923_vm0, %v1922_v0 }
 0x14b   : > { %1700 = vmatmul.mubr.msk.bf16.vlgmr.msra.gmra.mrb[12].mxu0 %vm700_vm8, %v1542_v1  ;;  %1718 = vmatmul.mubr.msk.bf16.vlgmr.msra.gmra.mrb[12].mxu1 %vm700_vm8, %v1551_v2 }
 0x1fe   : > { %v851_v5 = vpop.f32.mrb[8].mxu0  ;;  %v1029_v7 = vpop.f32.mrb[8].mxu1 }
 0x1ff   : > { %v863_v6 = vmul.f32 %v861_v3, %v851_v5  ;;  %v1665_v8 = vpop.f32.mrb[9].mxu0  ;;  %v1036_v0 = vmul.f32 %v1029_v7, %v861_v3  ;;  %v1683_v9 = vpop.f32.mrb[9].mxu1 }
 0x200   : > { %v854_v10 = vpop.f32.mrb[10].mxu0  ;;  %v1032_v12 = vpop.f32.mrb[10].mxu1 }
 0x201   : > { %v869_v11 = vadd.f32 %v867_v4, %v863_v6  ;;  %v1666_v13 = vpop.f32.mrb[11].mxu0  ;;  %v1037_v14 = vadd.f32 %v1036_v0, %v867_v4  ;;  %v1684_v15 = vpop.f32.mrb[11].mxu1 }
 0x203   : > { %v870_v16 = vmax.f32 %v869_v11, 0.0  ;;  %v1038_v17 = vmax.f32 %v1037_v14, 0.0 }
 0x205   : > { %v871_v18 = vpack.c.bf16 %v870_v16, %v870_v16  ;;  %v1039_v19 = vpack.c.bf16 %v1038_v17, %v1038_v17 }
 0x207   : > { %872 = vst [vmem:[%s293_s21] sm:$0x3] %v871_v18  ;;  %1536 = vst [vmem:[%s293_s21 + $0x2] sm:$0x3] %v1039_v19 }
 0x21e   : > { %v1198_v20 = vpop.f32.mrb[12].mxu0  ;;  %v1367_v22 = vpop.f32.mrb[12].mxu1 }
 0x21f   : > { %v1205_v21 = vmul.f32 %v1198_v20, %v861_v3  ;;  %v1701_v23 = vpop.f32.mrb[13].mxu0  ;;  %v1374_v24 = vmul.f32 %v1367_v22, %v861_v3  ;;  %v1719_v25 = vpop.f32.mrb[13].mxu1 }
 0x220   : > { %v1201_v27 = vpop.f32.mrb[14].mxu0  ;;  %v1370_v29 = vpop.f32.mrb[14].mxu1 }
 0x221   : > { %v1206_v28 = vadd.f32 %v1205_v21, %v867_v4  ;;  %v1702_v32 = vpop.f32.mrb[15].mxu0  ;;  %v1375_v30 = vadd.f32 %v1374_v24, %v867_v4  ;;  %v1720_v33 = vpop.f32.mrb[15].mxu1 }
 0x223   : > { %v1207_v34 = vmax.f32 %v1206_v28, 0.0  ;;  %v1376_v35 = vmax.f32 %v1375_v30, 0.0 }
 0x225   : > { %v1208_v31 = vpack.c.bf16 %v1207_v34, %v1207_v34  ;;  %v1377_v36 = vpack.c.bf16 %v1376_v35, %v1376_v35 }
 0x227   : > { %1545 = vst [vmem:[%s293_s21 + $0x4] sm:$0x3] %v1208_v31  ;;  %1554 = vst [vmem:[%s293_s21 + $0x6] sm:$0x3] %v1377_v36 }
 0x228   : > { %1855 = shalt.err (!%p1852_p5)
}
 0x229   : > { %s1856_s18 = scalar_lea.hbm %s2215_s10, 128  ;;  %s1860_s21 = scalar_lea.hbm %s2272_s7, 256 }
 0x22a   : > { %p1857_p6 = scmp.ne.s32.totalorder %s2215_s10, %s1856_s18  ;;  %p1861_p10 = scmp.lt.u32.totalorder %s2215_s10, %s2272_s7 }
 0x22b   : > { %p1862_p11 = scmp.lt.u32.totalorder %s1860_s21, %s1856_s18  ;;  %p1864_p13 = scmp.lt.u32.totalorder %s1856_s18, %s2215_s10 }
 0x22c   : > { %p1858_p7 = pnand %p1857_p6, %p2009_p4 }
 0x22d   : > { %p1863_p12 = por %p1862_p11, %p1861_p10 }
 0x22e   : > { %p1859_p9 = pneg %p1858_p7 }
 0x22f   : > { %p1865_p0 = por %p1864_p13, %p1863_p12 }
 0x231   : > { %p1866_p1 = pnand %p1865_p0, %p1859_p9 }
 0x233   : > { %1869 = shalt.err (!%p1866_p1)
}
 0x234   : > { %s1927_s8 = smov 32   ;;  %s1928_s15 = smov 2  }
 0x235   : > { %1754 = dma.vmem_to_hbm [thread:$0]  (%p2009_p4), %s2210_s22, 128, %s2215_s10, %s2219_s12, %s1927_s8, %s1927_s8, %s1928_s15  }
 0x236 PF: > { %p1760_p2 = scmp.ge.s32.totalorder %s1920_s29, 2  ;;  %s1410_s27 = sand.u32 1, %s1900_s24  }
 0x237   : > { %s1411_s16 = scalar_lea.sflag [#allocation4], %s1410_s27 }
 0x238   : > { %p1757_p3 = pnand %p1760_p2, %p2016_p8 }
 0x23a   : > { %1895 = dma.done.wait (!%p1757_p3), %s1411_s16, 128  }
 0x23b   : > { %1897 = vsyncadd (!%p1757_p3), %s1411_s16, 4294967168  ;;  %s20_s29 = sadd.s32 1, %s1920_s29   ;;  %s2277_s24 = smov %s1904_s25 }
 0x23c   : > { %p17_p5 = scmp.ge.s32.totalorder %s20_s29, 4   ;;  %s2278_s25 = smov %s1908_s26 }
 0x23d   : > { %s2279_s26 = smov %s2022_s14  ;;  %s2280_s27 = smov %s1916_s28 }
 0x23e   : > { %s2281_s28 = smov %s2283_s9  ;;  %19 = sbr.rel (!%p17_p5) target bundleno = 4 (0x4), region = 96 }
 0x245   :  { %1416 = vsyncpa [#allocation4], 1 }
 0x246   :  { %1418 = vsyncpa [#allocation4 + $0x1], 1 }

</bundles_post_ra>
